<compile_context>
chip_gen: v7x
topology: tpu7x:2x2x1
jax: 0.10.0
libtpu: 0.0.40
codegen_flags: <defaults>
</compile_context>

<pallas_src>
from functools import partial

import jax
import jax.numpy as jnp
from jax.experimental import pallas as pl
from jax.experimental.pallas import tpu as pltpu

STATE_DIM = 20
ACTION_DIM = 5
HIDDEN = 128
TB_MAX = 4096        # batch-tile rows (multiple of 8); ~5 MB live at f32, less at bf16
MIN_SPLIT = 128      # only split a single tile in two (for v7x megacore) above this


def dqn_kernel(x_ref, w1_ref, b1_ref, w2_ref, b2_ref, w3_ref, b3_ref, out_ref):
    # fc1 + relu  (MXU accumulates in f32; weights may be bf16 or f32)
    h1 = jnp.dot(x_ref[...], w1_ref[...], preferred_element_type=jnp.float32)
    h1 = jnp.maximum(h1 + b1_ref[...], 0.0)
    # fc2 + relu
    h2 = jnp.dot(h1.astype(w2_ref.dtype), w2_ref[...],
                 preferred_element_type=jnp.float32)
    h2 = jnp.maximum(h2 + b2_ref[...], 0.0)
    # fc3 (no activation) -- narrow (5-wide) output, store bytes are negligible
    q = jnp.dot(h2.astype(w3_ref.dtype), w3_ref[...],
                preferred_element_type=jnp.float32)
    out_ref[...] = (q + b3_ref[...]).astype(out_ref.dtype)


def _round_up(x, m):
    return ((x + m - 1) // m) * m


def _choose_tb(B):
    """Pick a batch-tile size that minimizes padding waste and, when there is
    enough work, yields >= 2 grid steps so v7x megacore gets both cores busy."""
    if B <= 2 * MIN_SPLIT:
        return max(8, _round_up(B, 8))
    n_steps = max(2, pl.cdiv(B, TB_MAX))
    return min(TB_MAX, _round_up(pl.cdiv(B, n_steps), 8))


def prepare_params(params, compute_dtype=jnp.bfloat16):
    """One-time param prep (hoisted out of the forward): cast weights to the
    MXU compute dtype; biases stay f32 (bias add / ReLU run in f32)."""
    return {
        "w1": params["w1"].astype(compute_dtype),
        "w2": params["w2"].astype(compute_dtype),
        "w3": params["w3"].astype(compute_dtype),
        "b1": params["b1"].astype(jnp.float32),
        "b2": params["b2"].astype(jnp.float32),
        "b3": params["b3"].astype(jnp.float32),
    }


@partial(jax.jit, static_argnames=("tb",))
def dqn_forward(state, prepared, tb=None):
    """state: (B, STATE_DIM); prepared: output of prepare_params()."""
    B = state.shape[0]
    if tb is None:
        tb = _choose_tb(B)
    assert tb % 8 == 0

    B_pad = _round_up(B, tb)
    compute_dtype = prepared["w1"].dtype
    x = state.astype(compute_dtype)
    if B_pad != B:
        x = jnp.pad(x, ((0, B_pad - B), (0, 0)))

    w1, b1 = prepared["w1"], prepared["b1"]
    w2, b2 = prepared["w2"], prepared["b2"]
    w3, b3 = prepared["w3"], prepared["b3"]

    # Weights/biases: full-array blocks, same block every grid step -> VMEM resident.
    def resident(a):
        nd = a.ndim
        return pl.BlockSpec(a.shape, lambda i, _nd=nd: (0,) * _nd)

    w_itemsize = jnp.dtype(compute_dtype).itemsize
    n_weight = STATE_DIM * HIDDEN + HIDDEN * HIDDEN + HIDDEN * ACTION_DIM
    cost = pl.CostEstimate(
        flops=2 * B_pad * n_weight,
        transcendentals=0,
        bytes_accessed=(B_pad * STATE_DIM * w_itemsize          # input
                        + n_weight * w_itemsize                 # weights
                        + (2 * HIDDEN + ACTION_DIM) * 4         # biases
                        + B_pad * ACTION_DIM * 4),              # output
    )

    out = pl.pallas_call(
        dqn_kernel,
        out_shape=jax.ShapeDtypeStruct((B_pad, ACTION_DIM), jnp.float32),
        grid=(B_pad // tb,),
        in_specs=[
            pl.BlockSpec((tb, STATE_DIM), lambda i: (i, 0)),   # state: tiled over batch
            resident(w1), resident(b1),
            resident(w2), resident(b2),
            resident(w3), resident(b3),
        ],
        out_specs=pl.BlockSpec((tb, ACTION_DIM), lambda i: (i, 0)),
        compiler_params=pltpu.CompilerParams(
            dimension_semantics=("parallel",),
            vmem_limit_bytes=32 * 1024 * 1024,
        ),
        cost_estimate=cost,
    )(x, w1, b1, w2, b2, w3, b3)

    # Drop padded batch rows only (output width is already ACTION_DIM).
    return out[:B]


def init_params(key):
    """Deterministic init mimicking PyTorch nn.Linear (uniform +/- 1/sqrt(fan_in)).
    Weights stored transposed vs PyTorch: (in_features, out_features)."""
    def linear(k, fan_in, fan_out):
        kw, kb = jax.random.split(k)
        bound = 1.0 / jnp.sqrt(fan_in)
        w = jax.random.uniform(kw, (fan_in, fan_out), jnp.float32, -bound, bound)
        b = jax.random.uniform(kb, (1, fan_out), jnp.float32, -bound, bound)
        return w, b

    k1, k2, k3 = jax.random.split(key, 3)
    w1, b1 = linear(k1, STATE_DIM, HIDDEN)
    w2, b2 = linear(k2, HIDDEN, HIDDEN)
    w3, b3 = linear(k3, HIDDEN, ACTION_DIM)
    return {"w1": w1, "b1": b1, "w2": w2, "b2": b2, "w3": w3, "b3": b3}


def reference_forward(state, params):
    h1 = jnp.maximum(state @ params["w1"] + params["b1"], 0.0)
    h2 = jnp.maximum(h1 @ params["w2"] + params["b2"], 0.0)
    return h2 @ params["w3"] + params["b3"]


if __name__ == "__main__":
    key = jax.random.PRNGKey(0)
    kp, kx = jax.random.split(key)
    params = init_params(kp)

    # Param prep done once (dtype casts hoisted out of the forward).
    prepared_f32 = prepare_params(params, jnp.float32)
    prepared_bf16 = prepare_params(params, jnp.bfloat16)

    # Small online-inference style batch (overhead-dominated; see notes above).
    batch = 8
    state = jax.random.normal(kx, (batch, STATE_DIM), jnp.float32)
    ref = reference_forward(state, params)

    # f32 path: tight tolerance.
    out_f32 = jax.block_until_ready(dqn_forward(state, prepared_f32))
    assert out_f32.shape == (batch, ACTION_DIM)
    assert jnp.allclose(out_f32, ref, atol=1e-4, rtol=1e-4)

    # bf16 path: MXU-native, looser tolerance (inputs/weights rounded to bf16).
    out_bf16 = jax.block_until_ready(dqn_forward(state, prepared_bf16))
    assert out_bf16.shape == (batch, ACTION_DIM)
    assert jnp.allclose(out_bf16, ref, atol=1e-1, rtol=1e-1)

    # Multi-tile path (ragged batch, >= 2 grid steps -> exercises megacore split).
    big_batch = 1000
    big_state = jax.random.normal(jax.random.PRNGKey(1), (big_batch, STATE_DIM),
                                  jnp.float32)
    big_ref = reference_forward(big_state, params)
    big_out = jax.block_until_ready(dqn_forward(big_state, prepared_bf16))
    assert big_out.shape == (big_batch, ACTION_DIM)
    assert jnp.allclose(big_out, big_ref, atol=1e-1, rtol=1e-1)

    print("KERNEL_OK")
</pallas_src>

<mosaic_0001>
module attributes {stable_mosaic.version = 11 : i64} {
  func.func @dqn_kernel(%arg0: i32, %arg1: memref<8x20xf32, #tpu.memory_space<vmem>>, %arg2: memref<20x128xf32, #tpu.memory_space<vmem>>, %arg3: memref<1x128xf32, #tpu.memory_space<vmem>>, %arg4: memref<128x128xf32, #tpu.memory_space<vmem>>, %arg5: memref<1x128xf32, #tpu.memory_space<vmem>>, %arg6: memref<128x5xf32, #tpu.memory_space<vmem>>, %arg7: memref<1x5xf32, #tpu.memory_space<vmem>>, %arg8: memref<8x5xf32, #tpu.memory_space<vmem>>) attributes {dimension_semantics = [#tpu.dimension_semantics<parallel>], iteration_bounds = array<i64: 1>, scalar_prefetch = 0 : i64, scratch_operands = 0 : i64, tpu.core_type = #tpu.core_type<tc>, window_params = [{transform_indices = @transform_0, window_bounds = array<i64: 8, 20>}, {pipeline_mode = #tpu.pipeline_mode<synchronous>, transform_indices = @transform_1, window_bounds = array<i64: 20, 128>}, {pipeline_mode = #tpu.pipeline_mode<synchronous>, transform_indices = @transform_2, window_bounds = array<i64: 1, 128>}, {pipeline_mode = #tpu.pipeline_mode<synchronous>, transform_indices = @transform_3, window_bounds = array<i64: 128, 128>}, {pipeline_mode = #tpu.pipeline_mode<synchronous>, transform_indices = @transform_4, window_bounds = array<i64: 1, 128>}, {pipeline_mode = #tpu.pipeline_mode<synchronous>, transform_indices = @transform_5, window_bounds = array<i64: 128, 5>}, {pipeline_mode = #tpu.pipeline_mode<synchronous>, transform_indices = @transform_6, window_bounds = array<i64: 1, 5>}, {transform_indices = @transform_7, window_bounds = array<i64: 8, 5>}]} {
    %c0 = arith.constant 0 : index
    %c0_0 = arith.constant 0 : index
    %0 = vector.load %arg1[%c0, %c0_0] : memref<8x20xf32, #tpu.memory_space<vmem>>, vector<8x20xf32>
    %c0_1 = arith.constant 0 : index
    %c0_2 = arith.constant 0 : index
    %1 = vector.load %arg2[%c0_1, %c0_2] : memref<20x128xf32, #tpu.memory_space<vmem>>, vector<20x128xf32>
    %cst = arith.constant dense<0.000000e+00> : vector<8x128xf32>
    %2 = tpu.matmul %0, %1, %cst {dimension_numbers = #tpu.dot_dimension_numbers<[1], [0], [0], [1], [0, 0, 1, 1], [], []>} : vector<8x20xf32>, vector<20x128xf32>, vector<8x128xf32> -> vector<8x128xf32>
    %c0_3 = arith.constant 0 : index
    %c0_4 = arith.constant 0 : index
    %3 = vector.load %arg3[%c0_3, %c0_4] : memref<1x128xf32, #tpu.memory_space<vmem>>, vector<1x128xf32>
    %4 = vector.broadcast %3 : vector<1x128xf32> to vector<8x128xf32>
    %5 = arith.addf %2, %4 : vector<8x128xf32>
    %cst_5 = arith.constant 0.000000e+00 : f32
    %6 = vector.broadcast %cst_5 : f32 to vector<8x128xf32>
    %7 = arith.maximumf %5, %6 : vector<8x128xf32>
    %c0_6 = arith.constant 0 : index
    %c0_7 = arith.constant 0 : index
    %8 = vector.load %arg4[%c0_6, %c0_7] : memref<128x128xf32, #tpu.memory_space<vmem>>, vector<128x128xf32>
    %cst_8 = arith.constant dense<0.000000e+00> : vector<8x128xf32>
    %9 = tpu.matmul %7, %8, %cst_8 {dimension_numbers = #tpu.dot_dimension_numbers<[1], [0], [0], [1], [0, 0, 1, 1], [], []>} : vector<8x128xf32>, vector<128x128xf32>, vector<8x128xf32> -> vector<8x128xf32>
    %c0_9 = arith.constant 0 : index
    %c0_10 = arith.constant 0 : index
    %10 = vector.load %arg5[%c0_9, %c0_10] : memref<1x128xf32, #tpu.memory_space<vmem>>, vector<1x128xf32>
    %11 = vector.broadcast %10 : vector<1x128xf32> to vector<8x128xf32>
    %12 = arith.addf %9, %11 : vector<8x128xf32>
    %cst_11 = arith.constant 0.000000e+00 : f32
    %13 = vector.broadcast %cst_11 : f32 to vector<8x128xf32>
    %14 = arith.maximumf %12, %13 : vector<8x128xf32>
    %c0_12 = arith.constant 0 : index
    %c0_13 = arith.constant 0 : index
    %15 = vector.load %arg6[%c0_12, %c0_13] : memref<128x5xf32, #tpu.memory_space<vmem>>, vector<128x5xf32>
    %cst_14 = arith.constant dense<0.000000e+00> : vector<8x5xf32>
    %16 = tpu.matmul %14, %15, %cst_14 {dimension_numbers = #tpu.dot_dimension_numbers<[1], [0], [0], [1], [0, 0, 1, 1], [], []>} : vector<8x128xf32>, vector<128x5xf32>, vector<8x5xf32> -> vector<8x5xf32>
    %c0_15 = arith.constant 0 : index
    %c0_16 = arith.constant 0 : index
    %17 = vector.load %arg7[%c0_15, %c0_16] : memref<1x5xf32, #tpu.memory_space<vmem>>, vector<1x5xf32>
    %18 = vector.broadcast %17 : vector<1x5xf32> to vector<8x5xf32>
    %19 = arith.addf %16, %18 : vector<8x5xf32>
    %c0_17 = arith.constant 0 : index
    %c0_18 = arith.constant 0 : index
    %20 = vector.load %arg8[%c0_17, %c0_18] : memref<8x5xf32, #tpu.memory_space<vmem>>, vector<8x5xf32>
    tpu.vector_store %arg8[%c0_17, %c0_18], %19 {strides = array<i32>} : memref<8x5xf32, #tpu.memory_space<vmem>>, vector<8x5xf32>,
    return
  }
  func.func @transform_0(%arg0: i32) -> (i32, i32) {
    %c0_i32 = arith.constant 0 : i32
    %c0_i32_0 = arith.constant 0 : i32
    return %arg0, %c0_i32 : i32, i32
  }
  func.func @transform_1(%arg0: i32) -> (i32, i32) {
    %c0_i32 = arith.constant 0 : i32
    %c0_i32_0 = arith.constant 0 : i32
    %c0_i32_1 = arith.constant 0 : i32
    return %c0_i32, %c0_i32_0 : i32, i32
  }
  func.func @transform_2(%arg0: i32) -> (i32, i32) {
    %c0_i32 = arith.constant 0 : i32
    %c0_i32_0 = arith.constant 0 : i32
    %c0_i32_1 = arith.constant 0 : i32
    return %c0_i32, %c0_i32_0 : i32, i32
  }
  func.func @transform_3(%arg0: i32) -> (i32, i32) {
    %c0_i32 = arith.constant 0 : i32
    %c0_i32_0 = arith.constant 0 : i32
    %c0_i32_1 = arith.constant 0 : i32
    return %c0_i32, %c0_i32_0 : i32, i32
  }
  func.func @transform_4(%arg0: i32) -> (i32, i32) {
    %c0_i32 = arith.constant 0 : i32
    %c0_i32_0 = arith.constant 0 : i32
    %c0_i32_1 = arith.constant 0 : i32
    return %c0_i32, %c0_i32_0 : i32, i32
  }
  func.func @transform_5(%arg0: i32) -> (i32, i32) {
    %c0_i32 = arith.constant 0 : i32
    %c0_i32_0 = arith.constant 0 : i32
    %c0_i32_1 = arith.constant 0 : i32
    return %c0_i32, %c0_i32_0 : i32, i32
  }
  func.func @transform_6(%arg0: i32) -> (i32, i32) {
    %c0_i32 = arith.constant 0 : i32
    %c0_i32_0 = arith.constant 0 : i32
    %c0_i32_1 = arith.constant 0 : i32
    return %c0_i32, %c0_i32_0 : i32, i32
  }
  func.func @transform_7(%arg0: i32) -> (i32, i32) {
    %c0_i32 = arith.constant 0 : i32
    %c0_i32_0 = arith.constant 0 : i32
    return %arg0, %c0_i32 : i32, i32
  }
}

</mosaic_0001>

<bundles_post_ra>
// kernel: dqn_forward.1
= control target key start
LH: loop header
LB: loop body
LE: loop exit
PB: predicated region body
PF: predicated region fallthrough
CT: control target
= control target key end

     0   :  { %12 = vsyncpa [#allocation3], 0  ;;  %s810_s0 = inlined_call_operand.hbm [shape: f32[8,20], index: 0, kind: input, shape index: {}]   ;;  %s811_s1 = inlined_call_operand.vmem [shape: f32[20,128], index: 1, kind: input, shape index: {}]   ;;  %s812_s2 = inlined_call_operand.vmem [shape: f32[1,128], index: 2, kind: input, shape index: {}]   ;;  %s813_s3 = inlined_call_operand.vmem [shape: f32[128,128], index: 3, kind: input, shape index: {}]   ;;  %s814_s4 = inlined_call_operand.vmem [shape: f32[1,128], index: 4, kind: input, shape index: {}]   ;;  %s815_s5 = inlined_call_operand.vmem [shape: f32[128,5], index: 5, kind: input, shape index: {}]   ;;  %s816_s6 = inlined_call_operand.hbm [shape: f32[1,5], index: 6, kind: input, shape index: {}]   ;;  %s817_s7 = inlined_call_operand.hbm [shape: f32[8,5], index: 7, kind: output, shape index: {}]  }
   0x1   :  { %13 = vsyncpa [#allocation6], 0 }
   0x2   :  { %14 = vsyncpa [#allocation4], 0  ;;  %s597_s24 = smov [#allocation2]   ;;  %s598_s26 = smov [#allocation5]  }
   0x3   :  { %s21_s25 = sshll.u32 %s597_s24, 4  ;;  %s41_s27 = sshll.u32 %s598_s26, 4  ;;  %s22_s25 = int_to_ptr.vmem [resolvable:$true] %s21_s25  ;;  %s42_s27 = int_to_ptr.vmem [resolvable:$true] %s41_s27 }
   0x4   :  { %s525_s30 = scalar_lea.hbm %s810_s0, 128 }
   0x5   :  { %p526_p0 = scmp.ne.s32.totalorder %s810_s0, %s525_s30  ;;  %p529_p1 = scmp.lt.u32.totalorder %s525_s30, %s810_s0 }
   0x7   :  { %p531_p2 = pnand %p529_p1, %p526_p0 }
   0x9   :  { %534 = shalt.err (!%p531_p2)
}
   0xa   :  { %s535_s12 = scalar_lea.vmem %s22_s25, 128  ;;  %p540_p4 = scmp.lt.s32.totalorder %s22_s25, %s22_s25 }
   0xb   :  { %p536_p3 = scmp.ne.s32.totalorder %s22_s25, %s535_s12  ;;  %p541_p5 = scmp.lt.s32.totalorder %s535_s12, %s535_s12 }
   0xd   :  { %p542_p6 = por %p541_p5, %p540_p4 }
   0xf   :  { %p543_p7 = pnand %p542_p6, %p536_p3 }
  0x11   :  { %546 = shalt.err (!%p543_p7)
}
  0x12   :  { %24 = dma.hbm_to_vmem [thread:$0]  %s810_s0, 128, %s22_s25, [#allocation3]  }
  0x13   :  { %s547_s17 = scalar_lea.hbm %s816_s6, 16 }
  0x14   :  { %p548_p8 = scmp.ne.s32.totalorder %s816_s6, %s547_s17  ;;  %p551_p9 = scmp.lt.u32.totalorder %s547_s17, %s816_s6 }
  0x16   :  { %p553_p10 = pnand %p551_p9, %p548_p8 }
  0x18   :  { %556 = shalt.err (!%p553_p10)
}
  0x19   :  { %s557_s22 = scalar_lea.vmem %s42_s27, 16  ;;  %s561_s23 = scalar_lea.vmem %s42_s27, 32 }
  0x1a   :  { %p558_p11 = scmp.ne.s32.totalorder %s42_s27, %s557_s22  ;;  %p562_p12 = scmp.lt.s32.totalorder %s42_s27, %s42_s27 }
  0x1b   :  { %p563_p13 = scmp.lt.s32.totalorder %s561_s23, %s557_s22 }
  0x1d   :  { %p564_p0 = por %p563_p13, %p562_p12 }
  0x1f   :  { %p565_p1 = pnand %p564_p0, %p558_p11 }
  0x21   :  { %568 = shalt.err (!%p565_p1)
}
  0x22   :  { %44 = dma.hbm_to_vmem [thread:$0]  %s816_s6, 16, %s42_s27, [#allocation6]  }
  0x23   :  { %591 = dma.done.wait [#allocation3], 128  }
  0x24   :  { %592 = vsyncadd [#allocation3], 4294967168 }
  0x25   :  { %593 = dma.done.wait [#allocation6], 16  }
  0x26   :  { %594 = vsyncadd [#allocation6], 4294967280  ;;  %v599_v0 = vmov 0.0|0.0   ;;  %vm600_vm0 = vmmov 0   ;;  %v601_v1 = vmov 0.0   ;;  %v52_v2 = vld [vmem:[%s811_s1] sm:$0xff] }
  0x27   :  { %468 = vmatprep.subr.bf16.mxu0 %v599_v0  ;;  %395 = vmatprep.mubr.msk.f32.mxu0 %vm600_vm0, %v601_v1  ;;  %v53_v3 = vld [vmem:[%s811_s1 + $0x8] sm:$0xff]  ;;  %v141_v5 = vld [vmem:[%s813_s3] sm:$0xff]  ;;  %v143_v8 = vld [vmem:[%s813_s3 + $0x10] sm:$0xff]  ;;  %vm66_vm1 = vcmask 1043456   ;;  %vm62_vm2 = vcmask 162816   ;;  %vm328_vm3 = vcmask 39936  }
  0x28   :  { %471 = vmatprep.subr.bf16.mxu1 %v599_v0  ;;  %430 = vmatprep.mubr.msk.f32.mxu1 %vm600_vm0, %v601_v1  ;;  %v469_v4 = vpack.c.bf16 %v53_v3, %v52_v2  ;;  %v142_v6 = vld [vmem:[%s813_s3 + $0x8] sm:$0xff]  ;;  %v144_v9 = vld [vmem:[%s813_s3 + $0x18] sm:$0xff]  ;;  %v54_v10 = vld [vmem:[%s811_s1 + $0x10] sm:$0xf] }
  0x29   :  { %v472_v7 = vpack.c.bf16 %v142_v6, %v141_v5  ;;  %v475_v11 = vpack.c.bf16 %v144_v9, %v143_v8  ;;  %v51_v12 = vld [vmem:[#allocation2] sm:$0xff]  ;;  %v146_v14 = vld [vmem:[%s813_s3 + $0x28] sm:$0xff]  ;;  %v147_v16 = vld [vmem:[%s813_s3 + $0x30] sm:$0xff] }
  0x2a   :  { %470 = vmatpush3.bf16.msra.mxu0 %v469_v4  ;;  %v145_v13 = vld [vmem:[%s813_s3 + $0x20] sm:$0xff]  ;;  %v148_v17 = vld [vmem:[%s813_s3 + $0x38] sm:$0xff]  ;;  %v150_v20 = vld [vmem:[%s813_s3 + $0x48] sm:$0xff] }
  0x2b   :  { %393 = vmatprep.subr.mxu0 %v601_v1  ;;  %473 = vmatpush3.bf16.msra.mxu1 %v472_v7  ;;  %v478_v15 = vpack.c.bf16 %v146_v14, %v145_v13  ;;  %v481_v18 = vpack.c.bf16 %v148_v17, %v147_v16  ;;  %v149_v19 = vld [vmem:[%s813_s3 + $0x40] sm:$0xff]  ;;  %v151_v22 = vld [vmem:[%s813_s3 + $0x50] sm:$0xff]  ;;  %v152_v23 = vld [vmem:[%s813_s3 + $0x58] sm:$0xff] }
  0x2c   :  { %474 = vmatprep.subr.bf16.mxu1 %v599_v0  ;;  %v484_v21 = vpack.c.bf16 %v150_v20, %v149_v19  ;;  %v487_v24 = vpack.c.bf16 %v152_v23, %v151_v22  ;;  %v153_v25 = vld [vmem:[%s813_s3 + $0x60] sm:$0xff]  ;;  %v154_v26 = vld [vmem:[%s813_s3 + $0x68] sm:$0xff]  ;;  %v155_v28 = vld [vmem:[%s813_s3 + $0x70] sm:$0xff] }
  0x2d   :  { %v490_v27 = vpack.c.bf16 %v154_v26, %v153_v25  ;;  %v156_v29 = vld [vmem:[%s813_s3 + $0x78] sm:$0xff]  ;;  %v235_v31 = vld [vmem:[%s815_s5] sm:$0xff]  ;;  %v236_v32 = vld [vmem:[%s815_s5 + $0x8] sm:$0xff] }
  0x2e   :  { %394 = vmatpush3.msk.msra.mxu0 %vm66_vm1, %v54_v10  ;;  %v493_v30 = vpack.c.bf16 %v156_v29, %v155_v28  ;;  %v237_v33 = vld [vmem:[%s815_s5 + $0x10] sm:$0xff]  ;;  %v496_v34 = vpack.c.bf16 %v236_v32, %v235_v31  ;;  %v238_v35 = vld [vmem:[%s815_s5 + $0x18] sm:$0xff]  ;;  %v239_v37 = vld [vmem:[%s815_s5 + $0x20] sm:$0xff] }
  0x2f   :  { %396 = vmatmul.mubr.msk.f32.vlgmr.msra.gmra.mrb[0].mxu0 %vm62_vm2, %v51_v12  ;;  %476 = vmatpush3.bf16.msra.mxu1 %v475_v11  ;;  %v499_v36 = vpack.c.bf16 %v238_v35, %v237_v33  ;;  %v240_v38 = vld [vmem:[%s815_s5 + $0x28] sm:$0xff]  ;;  %v241_v40 = vld [vmem:[%s815_s5 + $0x30] sm:$0xff]  ;;  %v242_v41 = vld [vmem:[%s815_s5 + $0x38] sm:$0xff] }
  0x30   :  { %477 = vmatprep.subr.bf16.mxu1 %v599_v0  ;;  %495 = vmatprep.subr.bf16.mxu0 %v599_v0  ;;  %v502_v39 = vpack.c.bf16 %v240_v38, %v239_v37  ;;  %v505_v42 = vpack.c.bf16 %v242_v41, %v241_v40  ;;  %v243_v43 = vld [vmem:[%s815_s5 + $0x40] sm:$0xff]  ;;  %v244_v44 = vld [vmem:[%s815_s5 + $0x48] sm:$0xff]  ;;  %v245_v46 = vld [vmem:[%s815_s5 + $0x50] sm:$0xff] }
  0x31   :  { %465 = vmatprep.mubr.msk.f32.mxu0 %vm600_vm0, %v601_v1  ;;  %497 = vmatpush3.bf16.msra.mxu0 %v496_v34  ;;  %v508_v45 = vpack.c.bf16 %v244_v44, %v243_v43  ;;  %v246_v47 = vld [vmem:[%s815_s5 + $0x58] sm:$0xff]  ;;  %v247_v49 = vld [vmem:[%s815_s5 + $0x60] sm:$0xff]  ;;  %v248_v50 = vld [vmem:[%s815_s5 + $0x68] sm:$0xff] }
  0x32   :  { %498 = vmatprep.subr.bf16.mxu0 %v599_v0  ;;  %v511_v48 = vpack.c.bf16 %v246_v47, %v245_v46  ;;  %v514_v51 = vpack.c.bf16 %v248_v50, %v247_v49  ;;  %v346_v52 = vld [vmem:[%s812_s2] ss:$0 sm:$0xff]  ;;  %v249_v57 = vld [vmem:[%s815_s5 + $0x70] sm:$0xff]  ;;  %v250_v58 = vld [vmem:[%s815_s5 + $0x78] sm:$0xff]  ;;  %s602_s2 = smov [#allocation7]  }
  0x33   :  { %479 = vmatpush3.bf16.msra.mxu1 %v478_v15  ;;  %v517_v59 = vpack.c.bf16 %v250_v58, %v249_v57  ;;  %v349_v60 = vld [vmem:[%s814_s4] ss:$0 sm:$0xff]  ;;  %v350_v1 = vld [vmem:[#allocation5] ss:$0 sm:$0xff]  ;;  %s336_s20 = sshll.u32 %s602_s2, 4  ;;  %s337_s20 = int_to_ptr.vmem [resolvable:$true] %s336_s20 }
  0x34   :  { %480 = vmatprep.subr.bf16.mxu1 %v599_v0  ;;  %s569_s5 = scalar_lea.vmem %s337_s20, 128  ;;  %p574_p3 = scmp.lt.s32.totalorder %s337_s20, %s337_s20 }
  0x35   :  { %500 = vmatpush3.bf16.msra.mxu0 %v499_v36  ;;  %p570_p2 = scmp.ne.s32.totalorder %s337_s20, %s569_s5  ;;  %p575_p4 = scmp.lt.s32.totalorder %s569_s5, %s569_s5 }
  0x36   :  { %501 = vmatprep.subr.bf16.mxu0 %v599_v0 }
  0x37   :  { %482 = vmatpush3.bf16.msra.mxu1 %v481_v18  ;;  %p576_p5 = por %p575_p4, %p574_p3 }
  0x38   :  { %483 = vmatprep.subr.bf16.mxu1 %v599_v0 }
  0x39   :  { %503 = vmatpush3.bf16.msra.mxu0 %v502_v39  ;;  %p577_p6 = pnand %p576_p5, %p570_p2 }
  0x3a   :  { %504 = vmatprep.subr.bf16.mxu0 %v599_v0 }
  0x3b   :  { %485 = vmatpush3.bf16.msra.mxu1 %v484_v21 }
  0x3c   :  { %486 = vmatprep.subr.bf16.mxu1 %v599_v0 }
  0x3d   :  { %506 = vmatpush3.bf16.msra.mxu0 %v505_v42 }
  0x3e   :  { %507 = vmatprep.subr.bf16.mxu0 %v599_v0 }
  0x3f   :  { %488 = vmatpush3.bf16.msra.mxu1 %v487_v24 }
  0x40   :  { %489 = vmatprep.subr.bf16.mxu1 %v599_v0 }
  0x41   :  { %509 = vmatpush3.bf16.msra.mxu0 %v508_v45 }
  0x42   :  { %510 = vmatprep.subr.bf16.mxu0 %v599_v0 }
  0x43   :  { %491 = vmatpush3.bf16.msra.mxu1 %v490_v27 }
  0x44   :  { %492 = vmatprep.subr.bf16.mxu1 %v599_v0 }
  0x45   :  { %512 = vmatpush3.bf16.msra.mxu0 %v511_v48 }
  0x46   :  { %513 = vmatprep.subr.bf16.mxu0 %v599_v0 }
  0x47   :  { %494 = vmatpush3.bf16.msra.mxu1 %v493_v30 }
  0x49   :  { %515 = vmatpush3.bf16.msra.mxu0 %v514_v51 }
  0x4a   :  { %516 = vmatprep.subr.bf16.mxu0 %v599_v0 }
  0x4d   :  { %518 = vmatpush3.bf16.msra.mxu0 %v517_v59 }
 0x102   :  { %v136_v53 = vpop.f32.mrb[0].mxu0 }
 0x103   :  { %v137_v54 = vadd.f32 %v346_v52, %v136_v53  ;;  %v397_v55 = vpop.f32.mrb[1].mxu0 }
 0x105   :  { %v140_v56 = vmax.f32 %v137_v54, 0.0 }
 0x107   :  { %431 = vmatmul.mubr.f32.vlgmr.msra.gmra.mrb[0].mxu1 %v140_v56 }
 0x1da   :  { %v230_v61 = vpop.f32.mrb[0].mxu1 }
 0x1db   :  { %v231_v62 = vadd.f32 %v349_v60, %v230_v61  ;;  %v432_v63 = vpop.f32.mrb[1].mxu1 }
 0x1dd   :  { %v234_v0 = vmax.f32 %v231_v62, 0.0 }
 0x1df   :  { %466 = vmatmul.mubr.f32.vlgmr.msra.gmra.mrb[2].mxu0 %v234_v0 }
 0x2b2   :  { %v324_v2 = vpop.f32.mrb[2].mxu0 }
 0x2b3   :  { %v325_v3 = vadd.f32 %v350_v1, %v324_v2  ;;  %v467_v4 = vpop.f32.mrb[3].mxu0 }
 0x2b5   :  { %329 = vst.msk [vmem:[#allocation7] sm:$0xff] %vm328_vm3, %v325_v3 }
 0x2b6   :  { %580 = shalt.err (!%p577_p6)
}
 0x2b7   :  { %s581_s22 = scalar_lea.hbm %s817_s7, 128 }
 0x2b8   :  { %p582_p7 = scmp.ne.s32.totalorder %s817_s7, %s581_s22  ;;  %p585_p8 = scmp.lt.u32.totalorder %s581_s22, %s817_s7 }
 0x2ba   :  { %p587_p9 = pnand %p585_p8, %p582_p7 }
 0x2bc   :  { %590 = shalt.err (!%p587_p9)
}
 0x2bd   :  { %339 = dma.vmem_to_hbm [thread:$0]  %s337_s20, 128, %s817_s7, [#allocation4]  }
 0x2be   :  { %595 = dma.done.wait [#allocation4], 128  }
 0x2bf   :  { %596 = vsyncadd [#allocation4], 4294967168 }
 0x2c0   :  { %343 = vsyncpa [#allocation3], 1 }
 0x2c1   :  { %344 = vsyncpa [#allocation6], 1 }
 0x2c2   :  { %345 = vsyncpa [#allocation4], 1 }

</bundles_post_ra>
